<compile_context>
chip_gen: v6e
topology: v6e:2x2x1
jax: 0.10.0
libtpu: 0.0.40
codegen_flags: <defaults>
</compile_context>

<pallas_src>
import functools
import math

import jax
import jax.numpy as jnp
from jax.experimental import pallas as pl
from jax.experimental.pallas import tpu as pltpu


def _fuser_kernel(sec_ref, prim_ref, wq_ref, bq_ref, wk_ref, bk_ref,
                  wv_ref, bv_ref, wo_ref, bo_ref, o_ref, *, B, Lq, Lk, D, F):
    """Single invocation: all 3 fusions and all batch rows at once."""
    sec = sec_ref[...]                      # (B*Lq, D)    shared `secondary`
    prim = prim_ref[...]                    # (B*Lk, F*D)  lane-stacked primaries

    # Fusion-packed projections: one MXU matmul each, 96-lane outputs.
    # W_q / b_q already carry the 1/sqrt(D) attention scale.
    q = jnp.dot(sec, wq_ref[...], preferred_element_type=jnp.float32) + bq_ref[...]
    k = jnp.dot(prim, wk_ref[...], preferred_element_type=jnp.float32) + bk_ref[...]
    v = jnp.dot(prim, wv_ref[...], preferred_element_type=jnp.float32) + bv_ref[...]

    # Per-fusion attention core (static unroll, F=3). The (Lq x Lk) score
    # matmuls are MXU drain-latency bound at these sizes, so the per-fusion
    # lane slices / reshapes here are off the critical path.
    unweighted = []
    for f in range(F):
        qf = q[:, f * D:(f + 1) * D].reshape(B, Lq, D)   # pre-scaled query
        kf = k[:, f * D:(f + 1) * D].reshape(B, Lk, D)
        vf = v[:, f * D:(f + 1) * D].reshape(B, Lk, D)

        s = jnp.einsum('bqd,bkd->bqk', qf, kf, preferred_element_type=jnp.float32)
        s = s - jnp.max(s, axis=-1, keepdims=True)
        e = jnp.exp(s)
        p = e * pl.reciprocal(jnp.sum(e, axis=-1, keepdims=True), approx=False)
        # Dropout: eval mode -> identity.
        uf = jnp.einsum('bqk,bkd->bqd', p, vf, preferred_element_type=jnp.float32)
        unweighted.append(uf.reshape(B * Lq, D))

    unw = jnp.concatenate(unweighted, axis=-1)            # (B*Lq, F*D)

    # Output projection: block-diagonal W_o, zero-padded to a 128-lane multiple
    # so this store is a lane-dense, unmasked vst.
    out = jnp.dot(unw, wo_ref[...], preferred_element_type=jnp.float32) + bo_ref[...]
    o_ref[...] = out.astype(o_ref.dtype)


def _block_diag(blocks):
    n = len(blocks)
    rows = []
    for i, blk in enumerate(blocks):
        row = [blk if j == i else jnp.zeros_like(blk) for j in range(n)]
        rows.append(jnp.concatenate(row, axis=1))
    return jnp.concatenate(rows, axis=0)


def _pack_fuser_params(params_list, d_model, out_width):
    """Pack per-fusion nn.Linear params into fused, lane-packed tensors.

    * weights transposed to (in, out) so the kernel computes x @ W,
    * 1/sqrt(d_model) attention scale folded into W_q / b_q,
    * the 3 W_q concatenated along lanes (shared `secondary` input),
    * W_k / W_v / W_o block-diagonal over the fusion axis,
    * W_o / b_o zero-padded to `out_width` lanes (unmasked output stores).
    """
    scale = 1.0 / math.sqrt(d_model)
    wq_l, bq_l, wk_l, bk_l, wv_l, bv_l, wo_l, bo_l = ([] for _ in range(8))
    for (wq, bq, wk, bk, wv, bv, wo, bo) in params_list:
        wq_l.append(wq.T * scale)
        bq_l.append(bq * scale)
        wk_l.append(wk.T)
        bk_l.append(bk)
        wv_l.append(wv.T)
        bv_l.append(bv)
        wo_l.append(wo.T)
        bo_l.append(bo)

    wq_p = jnp.concatenate(wq_l, axis=1)                  # (D, F*D)
    bq_p = jnp.concatenate(bq_l).reshape(1, -1)           # (1, F*D)
    wk_p = _block_diag(wk_l)                              # (F*D, F*D)
    bk_p = jnp.concatenate(bk_l).reshape(1, -1)
    wv_p = _block_diag(wv_l)                              # (F*D, F*D)
    bv_p = jnp.concatenate(bv_l).reshape(1, -1)
    wo_p = _block_diag(wo_l)                              # (F*D, F*D)
    bo_p = jnp.concatenate(bo_l).reshape(1, -1)

    pad = out_width - wo_p.shape[1]
    wo_p = jnp.pad(wo_p, ((0, 0), (0, pad)))              # (F*D, out_width)
    bo_p = jnp.pad(bo_p, ((0, 0), (0, pad)))              # (1, out_width)
    return wq_p, bq_p, wk_p, bk_p, wv_p, bv_p, wo_p, bo_p


def fuser(primary1, primary2, primary3, secondary, params1, params2, params3):
    """Fuser.forward: out_i = CrossAttention_i(secondary, primary_i, primary_i)."""
    B, Lq, D = secondary.shape
    _, Lk, _ = primary1.shape
    F = 3
    out_width = max(128, ((F * D + 127) // 128) * 128)    # lane-dense output slab

    # Host-side (free) reshapes: the kernel sees 2-D, lane-packed slabs.
    sec2d = secondary.reshape(B * Lq, D)
    prims = jnp.concatenate(
        [p.reshape(B * Lk, D) for p in (primary1, primary2, primary3)], axis=1)

    packed = _pack_fuser_params((params1, params2, params3), D, out_width)

    kernel = functools.partial(_fuser_kernel, B=B, Lq=Lq, Lk=Lk, D=D, F=F)
    vmem_spec = pl.BlockSpec(memory_space=pltpu.MemorySpace.VMEM)

    out = pl.pallas_call(
        kernel,
        out_shape=jax.ShapeDtypeStruct((B * Lq, out_width), secondary.dtype),
        in_specs=[vmem_spec] * (2 + len(packed)),
        out_specs=vmem_spec,
    )(sec2d, prims, *packed)

    # Free wrapper-side unpacking of the lane-dense output slab.
    out = out[:, :F * D].reshape(B, Lq, F, D)
    return out[:, :, 0, :], out[:, :, 1, :], out[:, :, 2, :]


def init_cross_attention_params(key, d_model):
    """Deterministic nn.Linear-style init: W:(out,in), b:(out,)."""
    ks = jax.random.split(key, 8)
    bound = 1.0 / math.sqrt(d_model)

    def lin(kw, kb):
        w = jax.random.uniform(kw, (d_model, d_model), jnp.float32, -bound, bound)
        b = jax.random.uniform(kb, (d_model,), jnp.float32, -bound, bound)
        return w, b

    wq, bq = lin(ks[0], ks[1])
    wk, bk = lin(ks[2], ks[3])
    wv, bv = lin(ks[4], ks[5])
    wo, bo = lin(ks[6], ks[7])
    return (wq, bq, wk, bk, wv, bv, wo, bo)


def _cross_attention_ref(q, kv, params):
    wq, bq, wk, bk, wv, bv, wo, bo = params
    D = q.shape[-1]
    query = q @ wq.T + bq
    key = kv @ wk.T + bk
    value = kv @ wv.T + bv
    scores = (query / math.sqrt(D)) @ jnp.swapaxes(key, 1, 2)
    attn = jax.nn.softmax(scores, axis=-1)
    return attn @ value @ wo.T + bo


if __name__ == "__main__":
    B, Lq, Lk, D = 2, 8, 8, 32   # batch, secondary seq, primary seq, d_model

    root = jax.random.PRNGKey(0)
    k_in, k_p1, k_p2, k_p3 = jax.random.split(root, 4)
    k_s, k_a, k_b, k_c = jax.random.split(k_in, 4)

    secondary = jax.random.normal(k_s, (B, Lq, D), jnp.float32)
    primary1 = jax.random.normal(k_a, (B, Lk, D), jnp.float32)
    primary2 = jax.random.normal(k_b, (B, Lk, D), jnp.float32)
    primary3 = jax.random.normal(k_c, (B, Lk, D), jnp.float32)

    params1 = init_cross_attention_params(k_p1, D)
    params2 = init_cross_attention_params(k_p2, D)
    params3 = init_cross_attention_params(k_p3, D)

    o1, o2, o3 = fuser(primary1, primary2, primary3, secondary,
                       params1, params2, params3)
    jax.block_until_ready((o1, o2, o3))

    # Sanity-check against a pure-JAX reference.
    r1 = _cross_attention_ref(secondary, primary1, params1)
    r2 = _cross_attention_ref(secondary, primary2, params2)
    r3 = _cross_attention_ref(secondary, primary3, params3)
    assert jnp.allclose(o1, r1, atol=2e-3, rtol=2e-3)
    assert jnp.allclose(o2, r2, atol=2e-3, rtol=2e-3)
    assert jnp.allclose(o3, r3, atol=2e-3, rtol=2e-3)

    print("KERNEL_OK")
</pallas_src>

<mosaic_0001>
module attributes {stable_mosaic.version = 11 : i64} {
  func.func @_fuser_kernel(%arg0: memref<16x32xf32, #tpu.memory_space<vmem>>, %arg1: memref<16x96xf32, #tpu.memory_space<vmem>>, %arg2: memref<32x96xf32, #tpu.memory_space<vmem>>, %arg3: memref<1x96xf32, #tpu.memory_space<vmem>>, %arg4: memref<96x96xf32, #tpu.memory_space<vmem>>, %arg5: memref<1x96xf32, #tpu.memory_space<vmem>>, %arg6: memref<96x96xf32, #tpu.memory_space<vmem>>, %arg7: memref<1x96xf32, #tpu.memory_space<vmem>>, %arg8: memref<96x128xf32, #tpu.memory_space<vmem>>, %arg9: memref<1x128xf32, #tpu.memory_space<vmem>>, %arg10: memref<16x128xf32, #tpu.memory_space<vmem>>) attributes {dimension_semantics = [], scalar_prefetch = 0 : i64, scratch_operands = 0 : i64, tpu.core_type = #tpu.core_type<tc>} {
    %c0 = arith.constant 0 : index
    %c0_0 = arith.constant 0 : index
    %0 = vector.load %arg0[%c0, %c0_0] : memref<16x32xf32, #tpu.memory_space<vmem>>, vector<16x32xf32>
    %c0_1 = arith.constant 0 : index
    %c0_2 = arith.constant 0 : index
    %1 = vector.load %arg1[%c0_1, %c0_2] : memref<16x96xf32, #tpu.memory_space<vmem>>, vector<16x96xf32>
    %c0_3 = arith.constant 0 : index
    %c0_4 = arith.constant 0 : index
    %2 = vector.load %arg2[%c0_3, %c0_4] : memref<32x96xf32, #tpu.memory_space<vmem>>, vector<32x96xf32>
    %cst = arith.constant dense<0.000000e+00> : vector<16x96xf32>
    %3 = tpu.matmul %0, %2, %cst {dimension_numbers = #tpu.dot_dimension_numbers<[1], [0], [0], [1], [0, 0, 1, 1], [], []>} : vector<16x32xf32>, vector<32x96xf32>, vector<16x96xf32> -> vector<16x96xf32>
    %c0_5 = arith.constant 0 : index
    %c0_6 = arith.constant 0 : index
    %4 = vector.load %arg3[%c0_5, %c0_6] : memref<1x96xf32, #tpu.memory_space<vmem>>, vector<1x96xf32>
    %5 = vector.broadcast %4 : vector<1x96xf32> to vector<16x96xf32>
    %6 = arith.addf %3, %5 : vector<16x96xf32>
    %c0_7 = arith.constant 0 : index
    %c0_8 = arith.constant 0 : index
    %7 = vector.load %arg4[%c0_7, %c0_8] : memref<96x96xf32, #tpu.memory_space<vmem>>, vector<96x96xf32>
    %cst_9 = arith.constant dense<0.000000e+00> : vector<16x96xf32>
    %8 = tpu.matmul %1, %7, %cst_9 {dimension_numbers = #tpu.dot_dimension_numbers<[1], [0], [0], [1], [0, 0, 1, 1], [], []>} : vector<16x96xf32>, vector<96x96xf32>, vector<16x96xf32> -> vector<16x96xf32>
    %c0_10 = arith.constant 0 : index
    %c0_11 = arith.constant 0 : index
    %9 = vector.load %arg5[%c0_10, %c0_11] : memref<1x96xf32, #tpu.memory_space<vmem>>, vector<1x96xf32>
    %10 = vector.broadcast %9 : vector<1x96xf32> to vector<16x96xf32>
    %11 = arith.addf %8, %10 : vector<16x96xf32>
    %c0_12 = arith.constant 0 : index
    %c0_13 = arith.constant 0 : index
    %12 = vector.load %arg6[%c0_12, %c0_13] : memref<96x96xf32, #tpu.memory_space<vmem>>, vector<96x96xf32>
    %cst_14 = arith.constant dense<0.000000e+00> : vector<16x96xf32>
    %13 = tpu.matmul %1, %12, %cst_14 {dimension_numbers = #tpu.dot_dimension_numbers<[1], [0], [0], [1], [0, 0, 1, 1], [], []>} : vector<16x96xf32>, vector<96x96xf32>, vector<16x96xf32> -> vector<16x96xf32>
    %c0_15 = arith.constant 0 : index
    %c0_16 = arith.constant 0 : index
    %14 = vector.load %arg7[%c0_15, %c0_16] : memref<1x96xf32, #tpu.memory_space<vmem>>, vector<1x96xf32>
    %15 = vector.broadcast %14 : vector<1x96xf32> to vector<16x96xf32>
    %16 = arith.addf %13, %15 : vector<16x96xf32>
    %17 = vector.extract_strided_slice %6 {offsets = [0, 0], sizes = [16, 32], strides = [1, 1]} : vector<16x96xf32> to vector<16x32xf32>
    %18 = vector.shape_cast %17 : vector<16x32xf32> to vector<2x8x32xf32>
    %19 = vector.extract_strided_slice %11 {offsets = [0, 0], sizes = [16, 32], strides = [1, 1]} : vector<16x96xf32> to vector<16x32xf32>
    %20 = vector.shape_cast %19 : vector<16x32xf32> to vector<2x8x32xf32>
    %21 = vector.extract_strided_slice %16 {offsets = [0, 0], sizes = [16, 32], strides = [1, 1]} : vector<16x96xf32> to vector<16x32xf32>
    %22 = vector.shape_cast %21 : vector<16x32xf32> to vector<2x8x32xf32>
    "tpu.trace_start"() <{level = 10 : i32, message = "bqd,bkd->bqk"}> : () -> ()
    %cst_17 = arith.constant dense<0.000000e+00> : vector<2x8x8xf32>
    %23 = tpu.matmul %18, %20, %cst_17 {dimension_numbers = #tpu.dot_dimension_numbers<[2], [2], [1], [1], [0, 0, 0, 1, 1, 1], [0], [0]>} : vector<2x8x32xf32>, vector<2x8x32xf32>, vector<2x8x8xf32> -> vector<2x8x8xf32>
    "tpu.trace_stop"() : () -> ()
    %cst_18 = arith.constant dense<0xFF800000> : vector<2x8xf32>
    %24 = vector.multi_reduction <maximumf>, %23, %cst_18 [2] : vector<2x8x8xf32> to vector<2x8xf32>
    %25 = vector.shape_cast %24 : vector<2x8xf32> to vector<2x8x1xf32>
    %26 = vector.broadcast %25 : vector<2x8x1xf32> to vector<2x8x8xf32>
    %27 = arith.subf %23, %26 : vector<2x8x8xf32>
    %28 = math.exp %27 : vector<2x8x8xf32>
    %cst_19 = arith.constant dense<0.000000e+00> : vector<2x8xf32>
    %29 = vector.multi_reduction <add>, %28, %cst_19 [2] : vector<2x8x8xf32> to vector<2x8xf32>
    %30 = vector.shape_cast %29 : vector<2x8xf32> to vector<2x8x1xf32>
    %31 = tpu.reciprocal %30 : vector<2x8x1xf32> -> vector<2x8x1xf32>
    %32 = vector.broadcast %31 : vector<2x8x1xf32> to vector<2x8x8xf32>
    %33 = arith.mulf %28, %32 : vector<2x8x8xf32>
    "tpu.trace_start"() <{level = 10 : i32, message = "bqk,bkd->bqd"}> : () -> ()
    %cst_20 = arith.constant dense<0.000000e+00> : vector<2x8x32xf32>
    %34 = tpu.matmul %33, %22, %cst_20 {dimension_numbers = #tpu.dot_dimension_numbers<[2], [1], [1], [2], [0, 0, 0, 1, 1, 2], [0], [0]>} : vector<2x8x8xf32>, vector<2x8x32xf32>, vector<2x8x32xf32> -> vector<2x8x32xf32>
    "tpu.trace_stop"() : () -> ()
    %35 = vector.shape_cast %34 : vector<2x8x32xf32> to vector<16x32xf32>
    %36 = vector.extract_strided_slice %6 {offsets = [0, 32], sizes = [16, 32], strides = [1, 1]} : vector<16x96xf32> to vector<16x32xf32>
    %37 = vector.shape_cast %36 : vector<16x32xf32> to vector<2x8x32xf32>
    %38 = vector.extract_strided_slice %11 {offsets = [0, 32], sizes = [16, 32], strides = [1, 1]} : vector<16x96xf32> to vector<16x32xf32>
    %39 = vector.shape_cast %38 : vector<16x32xf32> to vector<2x8x32xf32>
    %40 = vector.extract_strided_slice %16 {offsets = [0, 32], sizes = [16, 32], strides = [1, 1]} : vector<16x96xf32> to vector<16x32xf32>
    %41 = vector.shape_cast %40 : vector<16x32xf32> to vector<2x8x32xf32>
    "tpu.trace_start"() <{level = 10 : i32, message = "bqd,bkd->bqk"}> : () -> ()
    %cst_21 = arith.constant dense<0.000000e+00> : vector<2x8x8xf32>
    %42 = tpu.matmul %37, %39, %cst_21 {dimension_numbers = #tpu.dot_dimension_numbers<[2], [2], [1], [1], [0, 0, 0, 1, 1, 1], [0], [0]>} : vector<2x8x32xf32>, vector<2x8x32xf32>, vector<2x8x8xf32> -> vector<2x8x8xf32>
    "tpu.trace_stop"() : () -> ()
    %cst_22 = arith.constant dense<0xFF800000> : vector<2x8xf32>
    %43 = vector.multi_reduction <maximumf>, %42, %cst_22 [2] : vector<2x8x8xf32> to vector<2x8xf32>
    %44 = vector.shape_cast %43 : vector<2x8xf32> to vector<2x8x1xf32>
    %45 = vector.broadcast %44 : vector<2x8x1xf32> to vector<2x8x8xf32>
    %46 = arith.subf %42, %45 : vector<2x8x8xf32>
    %47 = math.exp %46 : vector<2x8x8xf32>
    %cst_23 = arith.constant dense<0.000000e+00> : vector<2x8xf32>
    %48 = vector.multi_reduction <add>, %47, %cst_23 [2] : vector<2x8x8xf32> to vector<2x8xf32>
    %49 = vector.shape_cast %48 : vector<2x8xf32> to vector<2x8x1xf32>
    %50 = tpu.reciprocal %49 : vector<2x8x1xf32> -> vector<2x8x1xf32>
    %51 = vector.broadcast %50 : vector<2x8x1xf32> to vector<2x8x8xf32>
    %52 = arith.mulf %47, %51 : vector<2x8x8xf32>
    "tpu.trace_start"() <{level = 10 : i32, message = "bqk,bkd->bqd"}> : () -> ()
    %cst_24 = arith.constant dense<0.000000e+00> : vector<2x8x32xf32>
    %53 = tpu.matmul %52, %41, %cst_24 {dimension_numbers = #tpu.dot_dimension_numbers<[2], [1], [1], [2], [0, 0, 0, 1, 1, 2], [0], [0]>} : vector<2x8x8xf32>, vector<2x8x32xf32>, vector<2x8x32xf32> -> vector<2x8x32xf32>
    "tpu.trace_stop"() : () -> ()
    %54 = vector.shape_cast %53 : vector<2x8x32xf32> to vector<16x32xf32>
    %55 = vector.extract_strided_slice %6 {offsets = [0, 64], sizes = [16, 32], strides = [1, 1]} : vector<16x96xf32> to vector<16x32xf32>
    %56 = vector.shape_cast %55 : vector<16x32xf32> to vector<2x8x32xf32>
    %57 = vector.extract_strided_slice %11 {offsets = [0, 64], sizes = [16, 32], strides = [1, 1]} : vector<16x96xf32> to vector<16x32xf32>
    %58 = vector.shape_cast %57 : vector<16x32xf32> to vector<2x8x32xf32>
    %59 = vector.extract_strided_slice %16 {offsets = [0, 64], sizes = [16, 32], strides = [1, 1]} : vector<16x96xf32> to vector<16x32xf32>
    %60 = vector.shape_cast %59 : vector<16x32xf32> to vector<2x8x32xf32>
    "tpu.trace_start"() <{level = 10 : i32, message = "bqd,bkd->bqk"}> : () -> ()
    %cst_25 = arith.constant dense<0.000000e+00> : vector<2x8x8xf32>
    %61 = tpu.matmul %56, %58, %cst_25 {dimension_numbers = #tpu.dot_dimension_numbers<[2], [2], [1], [1], [0, 0, 0, 1, 1, 1], [0], [0]>} : vector<2x8x32xf32>, vector<2x8x32xf32>, vector<2x8x8xf32> -> vector<2x8x8xf32>
    "tpu.trace_stop"() : () -> ()
    %cst_26 = arith.constant dense<0xFF800000> : vector<2x8xf32>
    %62 = vector.multi_reduction <maximumf>, %61, %cst_26 [2] : vector<2x8x8xf32> to vector<2x8xf32>
    %63 = vector.shape_cast %62 : vector<2x8xf32> to vector<2x8x1xf32>
    %64 = vector.broadcast %63 : vector<2x8x1xf32> to vector<2x8x8xf32>
    %65 = arith.subf %61, %64 : vector<2x8x8xf32>
    %66 = math.exp %65 : vector<2x8x8xf32>
    %cst_27 = arith.constant dense<0.000000e+00> : vector<2x8xf32>
    %67 = vector.multi_reduction <add>, %66, %cst_27 [2] : vector<2x8x8xf32> to vector<2x8xf32>
    %68 = vector.shape_cast %67 : vector<2x8xf32> to vector<2x8x1xf32>
    %69 = tpu.reciprocal %68 : vector<2x8x1xf32> -> vector<2x8x1xf32>
    %70 = vector.broadcast %69 : vector<2x8x1xf32> to vector<2x8x8xf32>
    %71 = arith.mulf %66, %70 : vector<2x8x8xf32>
    "tpu.trace_start"() <{level = 10 : i32, message = "bqk,bkd->bqd"}> : () -> ()
    %cst_28 = arith.constant dense<0.000000e+00> : vector<2x8x32xf32>
    %72 = tpu.matmul %71, %60, %cst_28 {dimension_numbers = #tpu.dot_dimension_numbers<[2], [1], [1], [2], [0, 0, 0, 1, 1, 2], [0], [0]>} : vector<2x8x8xf32>, vector<2x8x32xf32>, vector<2x8x32xf32> -> vector<2x8x32xf32>
    "tpu.trace_stop"() : () -> ()
    %73 = vector.shape_cast %72 : vector<2x8x32xf32> to vector<16x32xf32>
    %74 = tpu.concatenate %35, %54, %73 in 1 : vector<16x32xf32>, vector<16x32xf32>, vector<16x32xf32> -> vector<16x96xf32>
    %c0_29 = arith.constant 0 : index
    %c0_30 = arith.constant 0 : index
    %75 = vector.load %arg8[%c0_29, %c0_30] : memref<96x128xf32, #tpu.memory_space<vmem>>, vector<96x128xf32>
    %cst_31 = arith.constant dense<0.000000e+00> : vector<16x128xf32>
    %76 = tpu.matmul %74, %75, %cst_31 {dimension_numbers = #tpu.dot_dimension_numbers<[1], [0], [0], [1], [0, 0, 1, 1], [], []>} : vector<16x96xf32>, vector<96x128xf32>, vector<16x128xf32> -> vector<16x128xf32>
    %c0_32 = arith.constant 0 : index
    %c0_33 = arith.constant 0 : index
    %77 = vector.load %arg9[%c0_32, %c0_33] : memref<1x128xf32, #tpu.memory_space<vmem>>, vector<1x128xf32>
    %78 = vector.broadcast %77 : vector<1x128xf32> to vector<16x128xf32>
    %79 = arith.addf %76, %78 : vector<16x128xf32>
    %c0_34 = arith.constant 0 : index
    %c0_35 = arith.constant 0 : index
    %80 = vector.load %arg10[%c0_34, %c0_35] : memref<16x128xf32, #tpu.memory_space<vmem>>, vector<16x128xf32>
    tpu.vector_store %arg10[%c0_34, %c0_35], %79 {strides = array<i32>} : memref<16x128xf32, #tpu.memory_space<vmem>>, vector<16x128xf32>,
    return
  }
}

</mosaic_0001>

<bundles_post_ra>
// kernel: tpu_custom_call.1
= control target key start
LH: loop header
LB: loop body
LE: loop exit
PB: predicated region body
PF: predicated region fallthrough
CT: control target
= control target key end

     0   :  { %15 = vsyncpa [#allocation3], 0  ;;  %s2231_s0 = inlined_call_operand.hbm [shape: f32[16,32], index: 0, kind: input, shape index: {}]   ;;  %s2232_s1 = inlined_call_operand.hbm [shape: f32[16,96], index: 1, kind: input, shape index: {}]   ;;  %s2233_s2 = inlined_call_operand.hbm [shape: f32[32,96], index: 2, kind: input, shape index: {}]   ;;  %s2234_s3 = inlined_call_operand.vmem [shape: f32[1,96], index: 3, kind: input, shape index: {}]   ;;  %s2235_s4 = inlined_call_operand.hbm [shape: f32[96,96], index: 4, kind: input, shape index: {}]   ;;  %s2236_s5 = inlined_call_operand.vmem [shape: f32[1,96], index: 5, kind: input, shape index: {}]   ;;  %s2237_s6 = inlined_call_operand.hbm [shape: f32[96,96], index: 6, kind: input, shape index: {}]   ;;  %s2238_s7 = inlined_call_operand.vmem [shape: f32[1,96], index: 7, kind: input, shape index: {}]   ;;  %s2239_s8 = inlined_call_operand.hbm [shape: f32[96,128], index: 8, kind: input, shape index: {}]   ;;  %s2240_s9 = inlined_call_operand.vmem [shape: f32[1,128], index: 9, kind: input, shape index: {}]   ;;  %s2241_s10 = inlined_call_operand.hbm [shape: f32[16,128], index: 10, kind: output, shape index: {}]  }
   0x1   :  { %16 = vsyncpa [#allocation6], 0 }
   0x2   :  { %17 = vsyncpa [#allocation9], 0 }
   0x3   :  { %18 = vsyncpa [#allocation12], 0 }
   0x4   :  { %19 = vsyncpa [#allocation4], 0  ;;  %s1978_s13 = smov [#allocation5]   ;;  %s1979_s15 = smov [#allocation8]  }
   0x5   :  { %s37_s14 = sshll.u32 %s1978_s13, 4  ;;  %s63_s16 = sshll.u32 %s1979_s15, 4  ;;  %s38_s14 = int_to_ptr.vmem [resolvable:$true] %s37_s14  ;;  %s64_s16 = int_to_ptr.vmem [resolvable:$true] %s63_s16 }
   0x6   :  { %s1836_s17 = scalar_lea.vmem %s38_s14, 256  ;;  %p1841_p1 = scmp.lt.s32.totalorder %s38_s14, %s38_s14 }
   0x7   :  { %p1837_p0 = scmp.ne.s32.totalorder %s38_s14, %s1836_s17  ;;  %p1842_p2 = scmp.lt.s32.totalorder %s1836_s17, %s1836_s17 }
   0x9   :  { %p1843_p3 = por %p1842_p2, %p1841_p1 }
   0xb   :  { %p1844_p4 = pnand %p1843_p3, %p1837_p0 }
   0xd   :  { %1847 = shalt.err (!%p1844_p4)
}
   0xe   :  { %s1980_s18 = smov 128   ;;  %s1981_s19 = smov 8  }
   0xf   :  { %43 = dma.hbm_to_vmem [thread:$0]  %s2232_s1, 256, %s38_s14, [#allocation6], %s1980_s18, %s1980_s18, %s1981_s19  }
  0x10   :  { %s1856_s22 = scalar_lea.vmem %s64_s16, 1536  ;;  %p1861_p6 = scmp.lt.s32.totalorder %s64_s16, %s64_s16 }
  0x11   :  { %p1857_p5 = scmp.ne.s32.totalorder %s64_s16, %s1856_s22  ;;  %p1862_p7 = scmp.lt.s32.totalorder %s1856_s22, %s1856_s22 }
  0x13   :  { %p1863_p8 = por %p1862_p7, %p1861_p6 }
  0x15   :  { %p1864_p9 = pnand %p1863_p8, %p1857_p5 }
  0x17   :  { %1867 = shalt.err (!%p1864_p9)
}
  0x18   :  { %69 = dma.hbm_to_vmem [thread:$0]  %s2235_s4, 1536, %s64_s16, [#allocation9], %s1980_s18, %s1980_s18, %s1981_s19  }
  0x19   :  { %s1982_s25 = smov [#allocation2]   ;;  %s1983_s27 = smov [#allocation7]  }
  0x1a   :  { %s25_s26 = sshll.u32 %s1982_s25, 4  ;;  %s49_s28 = sshll.u32 %s1983_s27, 4  ;;  %s26_s26 = int_to_ptr.vmem [resolvable:$true] %s25_s26  ;;  %s50_s28 = int_to_ptr.vmem [resolvable:$true] %s49_s28 }
  0x1b   :  { %s1876_s1 = scalar_lea.vmem %s26_s26, 256  ;;  %p1881_p11 = scmp.lt.s32.totalorder %s26_s26, %s26_s26 }
  0x1c   :  { %p1877_p10 = scmp.ne.s32.totalorder %s26_s26, %s1876_s1  ;;  %p1882_p12 = scmp.lt.s32.totalorder %s1876_s1, %s1876_s1 }
  0x1e   :  { %p1883_p13 = por %p1882_p12, %p1881_p11 }
  0x20   :  { %p1884_p0 = pnand %p1883_p13, %p1877_p10 }
  0x22   :  { %1887 = shalt.err (!%p1884_p0)
}
  0x23   :  { %31 = dma.hbm_to_vmem [thread:$0]  %s2231_s0, 256, %s26_s26, [#allocation3], %s1980_s18, %s1980_s18, %s1981_s19  }
  0x24   :  { %s1896_s4 = scalar_lea.vmem %s50_s28, 512  ;;  %p1901_p2 = scmp.lt.s32.totalorder %s50_s28, %s50_s28 }
  0x25   :  { %p1897_p1 = scmp.ne.s32.totalorder %s50_s28, %s1896_s4  ;;  %p1902_p3 = scmp.lt.s32.totalorder %s1896_s4, %s1896_s4 }
  0x27   :  { %p1903_p4 = por %p1902_p3, %p1901_p2 }
  0x29   :  { %p1904_p5 = pnand %p1903_p4, %p1897_p1 }
  0x2b   :  { %1907 = shalt.err (!%p1904_p5)
}
  0x2c   :  { %55 = dma.hbm_to_vmem [thread:$0]  %s2233_s2, 512, %s50_s28, [#allocation6], %s1980_s18, %s1980_s18, %s1981_s19  }
  0x2d   :  { %s1984_s13 = smov [#allocation10]   ;;  %s1985_s15 = smov [#allocation11]  }
  0x2e   :  { %s77_s14 = sshll.u32 %s1984_s13, 4  ;;  %s91_s16 = sshll.u32 %s1985_s15, 4  ;;  %s78_s14 = int_to_ptr.vmem [resolvable:$true] %s77_s14  ;;  %s92_s16 = int_to_ptr.vmem [resolvable:$true] %s91_s16 }
  0x2f   :  { %s1916_s0 = scalar_lea.vmem %s78_s14, 1536  ;;  %p1921_p7 = scmp.lt.s32.totalorder %s78_s14, %s78_s14 }
  0x30   :  { %p1917_p6 = scmp.ne.s32.totalorder %s78_s14, %s1916_s0  ;;  %p1922_p8 = scmp.lt.s32.totalorder %s1916_s0, %s1916_s0 }
  0x32   :  { %p1923_p9 = por %p1922_p8, %p1921_p7 }
  0x34   :  { %p1924_p10 = pnand %p1923_p9, %p1917_p6 }
  0x36   :  { %1927 = shalt.err (!%p1924_p10)
}
  0x37   :  { %83 = dma.hbm_to_vmem [thread:$0]  %s2237_s6, 1536, %s78_s14, [#allocation9], %s1980_s18, %s1980_s18, %s1981_s19  }
  0x38   :  { %s1936_s2 = scalar_lea.vmem %s92_s16, 1536  ;;  %p1941_p12 = scmp.lt.s32.totalorder %s92_s16, %s92_s16 }
  0x39   :  { %p1937_p11 = scmp.ne.s32.totalorder %s92_s16, %s1936_s2  ;;  %p1942_p13 = scmp.lt.s32.totalorder %s1936_s2, %s1936_s2 }
  0x3b   :  { %p1943_p0 = por %p1942_p13, %p1941_p12 }
  0x3d   :  { %p1944_p1 = pnand %p1943_p0, %p1937_p11 }
  0x3f   :  { %1947 = shalt.err (!%p1944_p1)
}
  0x40   :  { %97 = dma.hbm_to_vmem [thread:$0]  %s2239_s8, 1536, %s92_s16, [#allocation12], %s1980_s18, %s1980_s18, %s1981_s19  }
  0x41   :  { %1968 = dma.done.wait [#allocation3], 256  }
  0x42   :  { %1969 = vsyncadd [#allocation3], 4294967040 }
  0x43   :  { %1970 = dma.done.wait [#allocation6], 768  }
  0x44   :  { %1971 = vsyncadd [#allocation6], 4294966528 }
  0x45   :  { %1972 = dma.done.wait [#allocation9], 3072  }
  0x46   :  { %1973 = vsyncadd [#allocation9], 4294964224 }
  0x47   :  { %1974 = dma.done.wait [#allocation12], 1536  }
  0x48   :  { %1975 = vsyncadd [#allocation12], 4294965760  ;;  %vm133_vm0 = vcmask 261120   ;;  %v125_v0 = vld [vmem:[#allocation7 + $0x18] sm:$0xff]  ;;  %v124_v1 = vld [vmem:[#allocation7 + $0x10] sm:$0xff]  ;;  %vm234_vm1 = vcmask 785408  }
  0x49   :  { %1638 = vmatprep.subr.mxu1 %v125_v0  ;;  %v118_v2 = vld [vmem:[#allocation2] sm:$0xff]  ;;  %v123_v3 = vld [vmem:[#allocation7 + $0x8] sm:$0xff]  ;;  %v226_v6 = vld [vmem:[#allocation8 + $0x58] sm:$0xff]  ;;  %v1986_v20 = vmov 0.0   ;;  %vm1987_vm2 = vmmov 0   ;;  %s1988_s25 = smov 96  }
  0x4a   :  { %1639 = vmatpush3.msra.mxu1 %v125_v0  ;;  %1646 = vmatprep.mubr.msk.f32.mxu1 %vm133_vm0, %v118_v2  ;;  %v122_v4 = vld [vmem:[#allocation7] sm:$0xff]  ;;  %v119_v5 = vld [vmem:[#allocation2 + $0x8] sm:$0xff]  ;;  %v120_v7 = vld [vmem:[#allocation5] sm:$0xff]  ;;  %vm562_vm3 = vcmask 64512   ;;  %s1990_s26 = smov 32   ;;  %vm1411_vm4 = vcmask 523264  }
  0x4b   :  { %1640 = vmatprep.subr.mxu1 %v124_v1  ;;  %1700 = vmatprep.mubr.msk.f32.mxu0 %vm234_vm1, %v120_v7  ;;  %v225_v8 = vld [vmem:[#allocation8 + $0x50] sm:$0xff]  ;;  %v224_v9 = vld [vmem:[#allocation8 + $0x48] sm:$0xff]  ;;  %v223_v10 = vld [vmem:[#allocation8 + $0x40] sm:$0xff]  ;;  %s1991_s1 = smov [#allocation13]  }
  0x4c   :  { %1641 = vmatpush3.msra.mxu1 %v124_v1  ;;  %v222_v11 = vld [vmem:[#allocation8 + $0x38] sm:$0xff]  ;;  %v221_v12 = vld [vmem:[#allocation8 + $0x30] sm:$0xff]  ;;  %v220_v13 = vld [vmem:[#allocation8 + $0x28] sm:$0xff]  ;;  %s1521_s29 = sshll.u32 %s1991_s1, 4  ;;  %s1522_s29 = int_to_ptr.vmem [resolvable:$true] %s1521_s29 }
  0x4d   :  { %1642 = vmatprep.subr.mxu1 %v123_v3  ;;  %v219_v14 = vld [vmem:[#allocation8 + $0x20] sm:$0xff]  ;;  %v218_v15 = vld [vmem:[#allocation8 + $0x18] sm:$0xff]  ;;  %v217_v16 = vld [vmem:[#allocation8 + $0x10] sm:$0xff]  ;;  %s1948_s30 = scalar_lea.vmem %s1522_s29, 256  ;;  %p1953_p3 = scmp.lt.s32.totalorder %s1522_s29, %s1522_s29 }
  0x4e   :  { %1643 = vmatpush3.msra.mxu1 %v123_v3  ;;  %v216_v17 = vld [vmem:[#allocation8 + $0x8] sm:$0xff]  ;;  %v215_v18 = vld [vmem:[#allocation8] sm:$0xff]  ;;  %v2087_v19 = vld [vmem:[#allocation5 + $0x8] sm:$0xff]  ;;  %p1949_p2 = scmp.ne.s32.totalorder %s1522_s29, %s1948_s30  ;;  %p1954_p4 = scmp.lt.s32.totalorder %s1948_s30, %s1948_s30 }
  0x4f   :  { %1644 = vmatprep.subr.mxu1 %v122_v4  ;;  %v1539_v23 = vld [vmem:[%s2236_s5] ss:$0 sm:$0xff]  ;;  %v327_v31 = vld [vmem:[#allocation10 + $0x58] sm:$0xff]  ;;  %v326_v32 = vld [vmem:[#allocation10 + $0x50] sm:$0xff] }
  0x50   :  { %1645 = vmatpush3.msra.mxu1 %v122_v4  ;;  %v1536_v26 = vld [vmem:[%s2234_s3] ss:$0 sm:$0xff]  ;;  %1676 = vmatprep.subr.mxu0 %v327_v31  ;;  %v325_v33 = vld [vmem:[#allocation10 + $0x48] sm:$0xff]  ;;  %v323_v35 = vld [vmem:[#allocation10 + $0x38] sm:$0xff]  ;;  %p1955_p5 = por %p1954_p4, %p1953_p3 }
  0x51   :  { %1647 = vmatmul.mubr.msk.f32.vlgmr.msra.gmra.mxu1 %vm133_vm0, %v119_v5  ;;  %1649 = vmatprep.subr.mxu1 %v226_v6  ;;  %v324_v34 = vld [vmem:[#allocation10 + $0x40] sm:$0xff]  ;;  %v322_v36 = vld [vmem:[#allocation10 + $0x30] sm:$0xff]  ;;  %v321_v37 = vld [vmem:[#allocation10 + $0x28] sm:$0xff] }
  0x52   :  { %1650 = vmatpush3.msra.mxu1 %v226_v6  ;;  %1673 = vmatprep.mubr.msk.f32.mxu1 %vm234_vm1, %v120_v7  ;;  %v320_v38 = vld [vmem:[#allocation10 + $0x20] sm:$0xff]  ;;  %v319_v39 = vld [vmem:[#allocation10 + $0x18] sm:$0xff]  ;;  %v318_v40 = vld [vmem:[#allocation10 + $0x10] sm:$0xff]  ;;  %p1956_p6 = pnand %p1955_p5, %p1949_p2 }
  0x53   :  { %1651 = vmatprep.subr.mxu1 %v225_v8  ;;  %1677 = vmatpush3.msra.mxu0 %v327_v31  ;;  %v317_v41 = vld [vmem:[#allocation10 + $0x8] sm:$0xff]  ;;  %v316_v42 = vld [vmem:[#allocation10] sm:$0xff] }
  0x54   :  { %1652 = vmatpush3.msra.mxu1 %v225_v8  ;;  %1678 = vmatprep.subr.mxu0 %v326_v32  ;;  %v1542_v63 = vld [vmem:[%s2238_s7] ss:$0 sm:$0xff]  ;;  %s1989_s7 = smov 64  }
  0x55   :  { %1653 = vmatprep.subr.mxu1 %v224_v9  ;;  %1679 = vmatpush3.msra.mxu0 %v326_v32 }
  0x56   :  { %1654 = vmatpush3.msra.mxu1 %v224_v9  ;;  %1680 = vmatprep.subr.mxu0 %v325_v33 }
  0x57   :  { %1655 = vmatprep.subr.mxu1 %v223_v10  ;;  %1681 = vmatpush3.msra.mxu0 %v325_v33 }
  0x58   :  { %1656 = vmatpush3.msra.mxu1 %v223_v10  ;;  %1682 = vmatprep.subr.mxu0 %v324_v34 }
  0x59   :  { %1657 = vmatprep.subr.mxu1 %v222_v11  ;;  %1683 = vmatpush3.msra.mxu0 %v324_v34 }
  0x5a   :  { %1658 = vmatpush3.msra.mxu1 %v222_v11  ;;  %1684 = vmatprep.subr.mxu0 %v323_v35 }
  0x5b   :  { %1659 = vmatprep.subr.mxu1 %v221_v12  ;;  %1685 = vmatpush3.msra.mxu0 %v323_v35 }
  0x5c   :  { %1660 = vmatpush3.msra.mxu1 %v221_v12  ;;  %1686 = vmatprep.subr.mxu0 %v322_v36 }
  0x5d   :  { %1661 = vmatprep.subr.mxu1 %v220_v13  ;;  %1687 = vmatpush3.msra.mxu0 %v322_v36 }
  0x5e   :  { %1662 = vmatpush3.msra.mxu1 %v220_v13  ;;  %1688 = vmatprep.subr.mxu0 %v321_v37 }
  0x5f   :  { %1663 = vmatprep.subr.mxu1 %v219_v14  ;;  %1689 = vmatpush3.msra.mxu0 %v321_v37 }
  0x60   :  { %1664 = vmatpush3.msra.mxu1 %v219_v14  ;;  %1690 = vmatprep.subr.mxu0 %v320_v38 }
  0x61   :  { %1665 = vmatprep.subr.mxu1 %v218_v15  ;;  %1691 = vmatpush3.msra.mxu0 %v320_v38 }
  0x62   :  { %1666 = vmatpush3.msra.mxu1 %v218_v15  ;;  %1692 = vmatprep.subr.mxu0 %v319_v39 }
  0x63   :  { %1667 = vmatprep.subr.mxu1 %v217_v16  ;;  %1693 = vmatpush3.msra.mxu0 %v319_v39 }
  0x64   :  { %1668 = vmatpush3.msra.mxu1 %v217_v16  ;;  %1694 = vmatprep.subr.mxu0 %v318_v40 }
  0x65   :  { %1669 = vmatprep.subr.mxu1 %v216_v17  ;;  %1695 = vmatpush3.msra.mxu0 %v318_v40 }
  0x66   :  { %1670 = vmatpush3.msra.mxu1 %v216_v17  ;;  %1696 = vmatprep.subr.mxu0 %v317_v41 }
  0x67   :  { %1671 = vmatprep.subr.mxu1 %v215_v18  ;;  %1697 = vmatpush3.msra.mxu0 %v317_v41 }
  0x68   :  { %1672 = vmatpush3.msra.mxu1 %v215_v18  ;;  %1698 = vmatprep.subr.mxu0 %v316_v42 }
  0x69   :  { %1674 = vmatmul.mubr.msk.f32.vlgmr.msra.gmra.mxu1 %vm234_vm1, %v2087_v19  ;;  %1703 = vmatprep.subr.mxu1 %v1986_v20 }
  0x6a   :  { %1705 = vmatprep.mubr.msk.f32.mxu1 %vm1987_vm2, %v1986_v20  ;;  %1699 = vmatpush3.msra.mxu0 %v316_v42 }
  0x6b   :  { %1701 = vmatmul.mubr.msk.f32.vlgmr.msra.gmra.mxu0 %vm234_vm1, %v2087_v19  ;;  %1723 = vmatprep.subr.mxu0 %v1986_v20 }
  0x6c   :  { %1725 = vmatprep.mubr.msk.f32.mxu0 %vm1987_vm2, %v1986_v20 }
 0x111   :  { %v1648_v21 = vpop.f32.mrf.mxu1 }
 0x112   :  { %v2119_v30 = vadd.f32 %v1648_v21, %v1536_v26 }
 0x113   :  { %v206_v22 = vpop.f32.mrf.mxu1 }
 0x114   :  { %v2106_v29 = vadd.f32 %v1536_v26, %v206_v22 }
 0x129   :  { %v1675_v24 = vpop.f32.mrf.mxu1 }
 0x12a   :  { %v2097_v25 = vadd.f32 %v1675_v24, %v1539_v23 }
 0x12b   :  { %v307_v27 = vpop.f32.mrf.mxu1  ;;  %v1702_v62 = vpop.f32.mrf.mxu0 }
 0x12c   :  { %v2102_v28 = vadd.f32 %v1539_v23, %v307_v27  ;;  %811 = vrot.lane.b32.xlu1 %v2097_v25, %s1988_s25  ;;  %v2145_v0 = vadd.f32 %v1702_v62, %v1542_v63 }
 0x12d   :  { %v401_v1 = vpop.f32.mrf.mxu0 }
 0x12e   :  { %1704 = vmatpush3.xpose.msk.msra.mxu1 %vm133_vm0, %v2102_v28  ;;  %v2147_v2 = vadd.f32 %v1542_v63, %v401_v1 }
 0x12f   :  { %1708 = vmatprep.subr.mxu1 %v1986_v20 }
 0x130   :  { %731 = vrot.lane.b32.xlu1 %v2106_v29, %s1988_s25 }
 0x131   :  { %1706 = vmatmul.mubr.msk.f32.vlgmr.msra.gmra.mxu1 %vm133_vm0, %v2106_v29 }
 0x132   :  { %1709 = vmatpush3.xpose.msk.msra.mxu1 %vm133_vm0, %v2097_v25  ;;  %1710 = vmatprep.mubr.msk.f32.mxu1 %vm1987_vm2, %v1986_v20 }
 0x133   :  { %1713 = vmatprep.subr.mxu1 %v1986_v20 }
 0x135   :  { %1711 = vmatmul.mubr.msk.f32.vlgmr.msra.gmra.mxu1 %vm133_vm0, %v2119_v30 }
 0x136   :  { %1715 = vmatprep.mubr.msk.f32.mxu1 %vm1987_vm2, %v1986_v20  ;;  %1714 = vmatpush3.msra.mxu1 %v2147_v2 }
 0x137   :  { %1718 = vmatprep.subr.mxu1 %v1986_v20 }
 0x19e   :  { %v812_v53 = vpop.permute.xlu1 %811 }
 0x1a2   :  { %v732_v57 = vpop.permute.xlu1 %731 }
 0x1f1   :  { %v482_v43 = vpop.f32.mrf.mxu1 }
 0x1f2   :  { %v563_v44 = vsel %vm562_vm3, %v482_v43, -inf }
 0x1f3   :  { %564 = vmax.xlane.f32.xlu0 %v563_v44  ;;  %v1707_v45 = vpop.f32.mrf.mxu1 }
 0x1f5   :  { %v558_v46 = vpop.f32.mrf.mxu1 }
 0x1f6   :  { %v566_v47 = vsel %vm562_vm3, %v558_v46, -inf }
 0x1f7   :  { %567 = vmax.xlane.f32.xlu0 %v566_v47  ;;  %v1712_v48 = vpop.f32.mrf.mxu1 }
 0x20d   :  { %733 = vrot.lane.b32.xlu0 %v2102_v28, %s1988_s25 }
 0x27c   :  { %v565_v49 = vpop.xlane.xlu0 %564 }
 0x27d   :  { %v569_v50 = vsub.f32 %v482_v43, %v565_v49 }
 0x27f   :  { %v571_v51 = vmul.f32 1.442695, %v569_v50 }
 0x280   :  { %v568_v52 = vpop.xlane.xlu0 %567 }
 0x281   :  { %1804 = vpow2.f32 %v571_v51  ;;  %v570_v54 = vsub.f32 %v558_v46, %v568_v52 }
 0x283   :  { %v573_v55 = vmul.f32 1.442695, %v570_v54 }
 0x284   :  { %v734_v56 = vpop.permute.xlu0 %733 }
 0x285   :  { %1806 = vpow2.f32 %v573_v55  ;;  %1724 = vmatpush3.xpose.msk.msra.mxu0 %vm133_vm0, %v734_v56 }
 0x286   :  { %1733 = vmatprep.subr.mxu0 %v1986_v20 }
 0x288   :  { %1726 = vmatmul.mubr.msk.f32.vlgmr.msra.gmra.mxu0 %vm133_vm0, %v732_v57 }
 0x289   :  { %1735 = vmatprep.mubr.msk.f32.mxu0 %vm1987_vm2, %v1986_v20 }
 0x28e   :  { %v1805_v58 = vpop.eup %1804 }
 0x28f   :  { %v575_v59 = vsel %vm562_vm3, %v1805_v58, 0.0 }
 0x290   :  { %576 = vadd.xlane.f32.xlu1 %v575_v59 }
 0x292   :  { %v1807_v60 = vpop.eup %1806 }
 0x293   :  { %v578_v61 = vsel %vm562_vm3, %v1807_v60, 0.0 }
 0x294   :  { %579 = vadd.xlane.f32.xlu1 %v578_v61 }
 0x2a5   :  { %809 = vrot.lane.b32.xlu1 %v2119_v30, %s1988_s25 }
 0x319   :  { %v577_v3 = vpop.xlane.xlu1 %576 }
 0x31a   :  { %1808 = vrcp.f32 %v577_v3 }
 0x31d   :  { %v580_v4 = vpop.xlane.xlu1 %579 }
 0x31e   :  { %1810 = vrcp.f32 %v580_v4 }
 0x321   :  { %v810_v9 = vpop.permute.xlu1 %809 }
 0x327   :  { %v1809_v5 = vpop.eup %1808 }
 0x328   :  { %v583_v6 = vmul.f32 %v1809_v5, %v1805_v58 }
 0x32a   :  { %1716 = vmatmul.mubr.msk.f32.vlgmr.msra.gmra.mxu1 %vm562_vm3, %v583_v6 }
 0x32b   :  { %v1811_v7 = vpop.eup %1810  ;;  %1719 = vmatpush3.msra.mxu1 %v2145_v0  ;;  %1720 = vmatprep.mubr.msk.f32.mxu1 %vm1987_vm2, %v1986_v20 }
 0x32c   :  { %1728 = vmatprep.subr.mxu1 %v1986_v20  ;;  %v584_v8 = vmul.f32 %v1811_v7, %v1807_v60  ;;  %v1425_v7 = vld [vmem:[#allocation11 + $0x58] sm:$0xff] }
 0x32e   :  { %1721 = vmatmul.mubr.msk.f32.vlgmr.msra.gmra.mxu1 %vm562_vm3, %v584_v8  ;;  %v1424_v8 = vld [vmem:[#allocation11 + $0x50] sm:$0xff] }
 0x32f   :  { %1729 = vmatpush3.xpose.msk.msra.mxu1 %vm133_vm0, %v812_v53  ;;  %1730 = vmatprep.mubr.msk.f32.mxu1 %vm1987_vm2, %v1986_v20 }
 0x330   :  { %1738 = vmatprep.subr.mxu1 %v1986_v20 }
 0x332   :  { %1731 = vmatmul.mubr.msk.f32.vlgmr.msra.gmra.mxu1 %vm133_vm0, %v810_v9  ;;  %v1423_v9 = vld [vmem:[#allocation11 + $0x48] sm:$0xff] }
 0x333   :  { %1740 = vmatprep.mubr.msk.f32.mxu1 %vm1987_vm2, %v1986_v20 }
 0x348   :  { %v805_v10 = vpop.f32.mrf.mxu0 }
 0x349   :  { %v887_v11 = vsel %vm562_vm3, %v805_v10, -inf }
 0x34a   :  { %888 = vmax.xlane.f32.xlu0 %v887_v11  ;;  %v1727_v12 = vpop.f32.mrf.mxu0  ;;  %v1420_v11 = vld [vmem:[#allocation11 + $0x30] sm:$0xff] }
 0x34b   :  { %v1419_v12 = vld [vmem:[#allocation11 + $0x28] sm:$0xff] }
 0x3d3   :  { %v889_v13 = vpop.xlane.xlu0 %888 }
 0x3d4   :  { %v893_v14 = vsub.f32 %v805_v10, %v889_v13  ;;  %v1421_v10 = vld [vmem:[#allocation11 + $0x38] sm:$0xff]  ;;  %v1418_v13 = vld [vmem:[#allocation11 + $0x20] sm:$0xff] }
 0x3d6   :  { %v895_v15 = vmul.f32 1.442695, %v893_v14  ;;  %v1417_v14 = vld [vmem:[#allocation11 + $0x18] sm:$0xff] }
 0x3d8   :  { %1812 = vpow2.f32 %v895_v15  ;;  %v1416_v15 = vld [vmem:[#allocation11 + $0x10] sm:$0xff] }
 0x3e5   :  { %v1813_v16 = vpop.eup %1812 }
 0x3e6   :  { %v899_v17 = vsel %vm562_vm3, %v1813_v16, 0.0 }
 0x3e7   :  { %900 = vadd.xlane.f32.xlu0 %v899_v17  ;;  %v1414_v17 = vld [vmem:[#allocation11] sm:$0xff] }
 0x3ea   :  { %v2168_v18 = vpop.f32.mrf.mxu1 }
 0x3ec   :  { %v1717_v19 = vpop.f32.mrf.mxu1 }
 0x3ee   :  { %v2170_v21 = vpop.f32.mrf.mxu1 }
 0x3f0   :  { %v1722_v22 = vpop.f32.mrf.mxu1 }
 0x3f2   :  { %v883_v23 = vpop.f32.mrf.mxu1 }
 0x3f3   :  { %v890_v24 = vsel %vm562_vm3, %v883_v23, -inf }
 0x3f4   :  { %891 = vmax.xlane.f32.xlu1 %v890_v24  ;;  %v1732_v26 = vpop.f32.mrf.mxu1 }
 0x3fd   :  { %910 = vrot.lane.b32.xlu0 %v2147_v2, %s1988_s25 }
 0x405   :  { %987 = vrot.lane.b32.xlu1 %v2145_v0, %s1988_s25 }
 0x409   :  { %1065 = vrot.lane.b32.xlu1 %v2102_v28, %s1989_s7 }
 0x40d   :  { %1143 = vrot.lane.b32.xlu1 %v2097_v25, %s1989_s7 }
 0x411   :  { %1141 = vrot.lane.b32.xlu1 %v2119_v30, %s1989_s7 }
 0x470   :  { %v901_v27 = vpop.xlane.xlu0 %900 }
 0x471   :  { %1814 = vrcp.f32 %v901_v27 }
 0x474   :  { %v911_v31 = vpop.permute.xlu0 %910 }
 0x475   :  { %1734 = vmatpush3.msra.mxu0 %v911_v31 }
 0x476   :  { %1743 = vmatprep.subr.mxu0 %v1986_v20 }
 0x47d   :  { %v892_v32 = vpop.xlane.xlu1 %891 }
 0x47e   :  { %v1815_v33 = vpop.eup %1814  ;;  %v894_v34 = vsub.f32 %v883_v23, %v892_v32 }
 0x47f   :  { %v907_v35 = vmul.f32 %v1815_v33, %v1813_v16  ;;  %v1415_v16 = vld [vmem:[#allocation11 + $0x8] sm:$0xff] }
 0x480   :  { %v897_v36 = vmul.f32 1.442695, %v894_v34 }
 0x481   :  { %1736 = vmatmul.mubr.msk.f32.vlgmr.msra.gmra.mxu0 %vm562_vm3, %v907_v35  ;;  %v988_v28 = vpop.permute.xlu1 %987 }
 0x482   :  { %1816 = vpow2.f32 %v897_v36  ;;  %1739 = vmatpush3.msra.mxu1 %v988_v28  ;;  %1745 = vmatprep.mubr.msk.f32.mxu0 %vm1987_vm2, %v1986_v20  ;;  %v1563_v28 = vld [vmem:[%s2240_s9] ss:$0 sm:$0xff] }
 0x483   :  { %1748 = vmatprep.subr.mxu1 %v1986_v20 }
 0x485   :  { %v1066_v25 = vpop.permute.xlu1 %1065 }
 0x486   :  { %1744 = vmatpush3.xpose.msk.msra.mxu0 %vm133_vm0, %v1066_v25 }
 0x487   :  { %1753 = vmatprep.subr.mxu0 %v1986_v20 }
 0x489   :  { %v1144_v41 = vpop.permute.xlu1 %1143 }
 0x48f   :  { %v1817_v30 = vpop.eup %1816 }
 0x490   :  { %v902_v37 = vsel %vm562_vm3, %v1817_v30, 0.0 }
 0x491   :  { %903 = vadd.xlane.f32.xlu0 %v902_v37 }
 0x4a7   :  { %1063 = vrot.lane.b32.xlu0 %v2106_v29, %s1989_s7  ;;  %v1142_v29 = vpop.permute.xlu1 %1141 }
 0x51a   :  { %v904_v38 = vpop.xlane.xlu0 %903 }
 0x51b   :  { %1818 = vrcp.f32 %v904_v38 }
 0x51e   :  { %v1064_v39 = vpop.permute.xlu0 %1063 }
 0x51f   :  { %1746 = vmatmul.mubr.msk.f32.vlgmr.msra.gmra.mxu0 %vm133_vm0, %v1064_v39 }
 0x520   :  { %1755 = vmatprep.mubr.msk.f32.mxu0 %vm1987_vm2, %v1986_v20 }
 0x528   :  { %v1819_v40 = vpop.eup %1818 }
 0x529   :  { %v908_v42 = vmul.f32 %v1819_v40, %v1817_v30 }
 0x52b   :  { %1741 = vmatmul.mubr.msk.f32.vlgmr.msra.gmra.mxu1 %vm562_vm3, %v908_v42 }
 0x52c   :  { %1749 = vmatpush3.xpose.msk.msra.mxu1 %vm133_vm0, %v1144_v41  ;;  %1750 = vmatprep.mubr.msk.f32.mxu1 %vm1987_vm2, %v1986_v20 }
 0x52d   :  { %1758 = vmatprep.subr.mxu1 %v1986_v20 }
 0x52f   :  { %1751 = vmatmul.mubr.msk.f32.vlgmr.msra.gmra.mxu1 %vm133_vm0, %v1142_v29 }
 0x530   :  { %1760 = vmatprep.mubr.msk.f32.mxu1 %vm1987_vm2, %v1986_v20 }
 0x541   :  { %v982_v43 = vpop.f32.mrf.mxu0 }
 0x543   :  { %v1737_v44 = vpop.f32.mrf.mxu0 }
 0x5df   :  { %v1137_v45 = vpop.f32.mrf.mxu0 }
 0x5e0   :  { %v1219_v46 = vsel %vm562_vm3, %v1137_v45, -inf }
 0x5e1   :  { %1220 = vmax.xlane.f32.xlu0 %v1219_v46  ;;  %v1747_v47 = vpop.f32.mrf.mxu0 }
 0x5eb   :  { %v1059_v48 = vpop.f32.mrf.mxu1 }
 0x5ed   :  { %v1742_v49 = vpop.f32.mrf.mxu1 }
 0x5ef   :  { %v1215_v50 = vpop.f32.mrf.mxu1 }
 0x5f0   :  { %v1222_v51 = vsel %vm562_vm3, %v1215_v50, -inf }
 0x5f1   :  { %1223 = vmax.xlane.f32.xlu1 %v1222_v51  ;;  %v1752_v52 = vpop.f32.mrf.mxu1 }
 0x602   :  { %1317 = vrot.lane.b32.xlu1 %v2145_v0, %s1989_s7 }
 0x606   :  { %1395 = vrot.lane.b32.xlu1 %v982_v43, %s1990_s26 }
 0x60a   :  { %1397 = vrot.lane.b32.xlu1 %v1059_v48, %s1990_s26 }
 0x66a   :  { %v1221_v20 = vpop.xlane.xlu0 %1220 }
 0x66b   :  { %v1225_v53 = vsub.f32 %v1137_v45, %v1221_v20 }
 0x66d   :  { %v1227_v54 = vmul.f32 1.442695, %v1225_v53 }
 0x66f   :  { %1820 = vpow2.f32 %v1227_v54 }
 0x67a   :  { %v1224_v55 = vpop.xlane.xlu1 %1223 }
 0x67b   :  { %v1226_v56 = vsub.f32 %v1215_v50, %v1224_v55 }
 0x67c   :  { %v1821_v57 = vpop.eup %1820 }
 0x67d   :  { %v1229_v58 = vmul.f32 1.442695, %v1226_v56  ;;  %v1231_v59 = vsel %vm562_vm3, %v1821_v57, 0.0 }
 0x67e   :  { %1232 = vadd.xlane.f32.xlu0 %v1231_v59  ;;  %v1318_v60 = vpop.permute.xlu1 %1317 }
 0x67f   :  { %1822 = vpow2.f32 %v1229_v58  ;;  %1759 = vmatpush3.msra.mxu1 %v1318_v60 }
 0x682   :  { %v1396_v26 = vpop.permute.xlu1 %1395 }
 0x683   :  { %v1409_v27 = vsel %vm133_vm0, %v2168_v18, %v1396_v26 }
 0x686   :  { %v1398_v33 = vpop.permute.xlu1 %1397 }
 0x687   :  { %v1410_v34 = vsel %vm133_vm0, %v2170_v21, %v1398_v33 }
 0x68c   :  { %v1823_v61 = vpop.eup %1822 }
 0x68d   :  { %v1234_v62 = vsel %vm562_vm3, %v1823_v61, 0.0 }
 0x68e   :  { %1235 = vadd.xlane.f32.xlu0 %v1234_v62 }
 0x6a4   :  { %1241 = vrot.lane.b32.xlu0 %v2147_v2, %s1989_s7  ;;  %v1422_v2 = vld [vmem:[#allocation11 + $0x40] sm:$0xff] }
 0x707   :  { %v1233_v63 = vpop.xlane.xlu0 %1232 }
 0x708   :  { %1824 = vrcp.f32 %v1233_v63 }
 0x715   :  { %v1825_v1 = vpop.eup %1824 }
 0x716   :  { %v1239_v4 = vmul.f32 %v1825_v1, %v1821_v57 }
 0x717   :  { %v1236_v0 = vpop.xlane.xlu0 %1235 }
 0x718   :  { %1826 = vrcp.f32 %v1236_v0 }
 0x71b   :  { %v1242_v3 = vpop.permute.xlu0 %1241 }
 0x71c   :  { %1754 = vmatpush3.msra.mxu0 %v1242_v3 }
 0x71d   :  { %1756 = vmatmul.mubr.msk.f32.vlgmr.msra.gmra.mxu0 %vm562_vm3, %v1239_v4  ;;  %1763 = vmatprep.subr.mxu0 %v1425_v7 }
 0x71e   :  { %1764 = vmatpush3.msra.mxu0 %v1425_v7 }
 0x71f   :  { %1765 = vmatprep.subr.mxu0 %v1424_v8 }
 0x720   :  { %1766 = vmatpush3.msra.mxu0 %v1424_v8 }
 0x721   :  { %1767 = vmatprep.subr.mxu0 %v1423_v9 }
 0x722   :  { %1768 = vmatpush3.msra.mxu0 %v1423_v9 }
 0x723   :  { %1769 = vmatprep.subr.mxu0 %v1422_v2 }
 0x724   :  { %1770 = vmatpush3.msra.mxu0 %v1422_v2 }
 0x725   :  { %v1827_v5 = vpop.eup %1826  ;;  %1771 = vmatprep.subr.mxu0 %v1421_v10 }
 0x726   :  { %v1240_v6 = vmul.f32 %v1827_v5, %v1823_v61  ;;  %1772 = vmatpush3.msra.mxu0 %v1421_v10 }
 0x727   :  { %1773 = vmatprep.subr.mxu0 %v1420_v11 }
 0x728   :  { %1761 = vmatmul.mubr.msk.f32.vlgmr.msra.gmra.mxu1 %vm562_vm3, %v1240_v6  ;;  %1774 = vmatpush3.msra.mxu0 %v1420_v11 }
 0x729   :  { %1775 = vmatprep.subr.mxu0 %v1419_v12 }
 0x72a   :  { %1776 = vmatpush3.msra.mxu0 %v1419_v12 }
 0x72b   :  { %1777 = vmatprep.subr.mxu0 %v1418_v13 }
 0x72c   :  { %1778 = vmatpush3.msra.mxu0 %v1418_v13 }
 0x72d   :  { %1779 = vmatprep.subr.mxu0 %v1417_v14 }
 0x72e   :  { %1780 = vmatpush3.msra.mxu0 %v1417_v14 }
 0x72f   :  { %1781 = vmatprep.subr.mxu0 %v1416_v15 }
 0x730   :  { %1782 = vmatpush3.msra.mxu0 %v1416_v15 }
 0x731   :  { %1783 = vmatprep.subr.mxu0 %v1415_v16 }
 0x732   :  { %1784 = vmatpush3.msra.mxu0 %v1415_v16 }
 0x733   :  { %1785 = vmatprep.subr.mxu0 %v1414_v17 }
 0x734   :  { %1786 = vmatpush3.msra.mxu0 %v1414_v17 }
 0x7dd   :  { %v1313_v19 = vpop.f32.mrf.mxu0 }
 0x7de   :  { %1403 = vrot.lane.b32.xlu0 %v1313_v19, %s1989_s7 }
 0x7df   :  { %v1757_v22 = vpop.f32.mrf.mxu0 }
 0x7e8   :  { %v1389_v23 = vpop.f32.mrf.mxu1 }
 0x7e9   :  { %1405 = vrot.lane.b32.xlu1 %v1389_v23, %s1989_s7 }
 0x7ea   :  { %v1762_v24 = vpop.f32.mrf.mxu1 }
 0x850   :  { %v1404_v31 = vpop.permute.xlu0 %1403 }
 0x851   :  { %v1412_v32 = vsel %vm1411_vm4, %v1409_v27, %v1404_v31 }
 0x852   :  { %1787 = vmatprep.mubr.msk.f32.mxu0 %vm234_vm1, %v1412_v32 }
 0x85b   :  { %v1406_v35 = vpop.permute.xlu1 %1405 }
 0x85c   :  { %v1413_v36 = vsel %vm1411_vm4, %v1410_v34, %v1406_v35 }
 0x85d   :  { %1788 = vmatmul.mubr.msk.f32.vlgmr.msra.gmra.mxu0 %vm234_vm1, %v1413_v36 }
 0x91d   :  { %v1789_v25 = vpop.f32.mrf.mxu0 }
 0x91e   :  { %v1511_v18 = vadd.f32 %v1789_v25, %v1563_v28 }
 0x91f   :  { %v1505_v30 = vpop.f32.mrf.mxu0 }
 0x920   :  { %1515 = vst [vmem:[#allocation13 + $0x8] sm:$0xff] %v1511_v18  ;;  %v1506_v37 = vadd.f32 %v1563_v28, %v1505_v30 }
 0x922   :  { %1514 = vst [vmem:[#allocation13] sm:$0xff] %v1506_v37 }
 0x923   :  { %1959 = shalt.err (!%p1956_p6)
}
 0x924   :  { %1527 = dma.vmem_to_hbm [thread:$0]  %s1522_s29, 256, %s2241_s10, [#allocation4], %s1980_s18, %s1980_s18, %s1981_s19  }
 0x925   :  { %1976 = dma.done.wait [#allocation4], 256  }
 0x926   :  { %1977 = vsyncadd [#allocation4], 4294967040 }
 0x927   :  { %1531 = vsyncpa [#allocation3], 1 }
 0x928   :  { %1532 = vsyncpa [#allocation6], 1 }
 0x929   :  { %1533 = vsyncpa [#allocation9], 1 }
 0x92a   :  { %1534 = vsyncpa [#allocation12], 1 }
 0x92b   :  { %1535 = vsyncpa [#allocation4], 1 }

</bundles_post_ra>
